<compile_context>
chip_gen: v5e
topology: v5e:2x2
jax: 0.10.0
libtpu: 0.0.40
codegen_flags: <defaults>
</compile_context>

<pallas_src>
import jax
import jax.numpy as jnp
from jax.experimental import pallas as pl
from jax.experimental.pallas import tpu as pltpu


def broadcast_store_kernel(y_ref, out_ref):
    # y_ref  : (1, L)   batch-invariant, lane-dense flattened target rows
    # out_ref: (Bt, L)  one batch block of the output per grid step
    # L = Nt*E (128 for the example shapes) -> unmasked full-lane stores; the
    # sublane broadcast lets Mosaic reuse a single vreg for Bt/8 stores.
    out_ref[...] = jnp.broadcast_to(y_ref[...], out_ref.shape)


def _pick_batch_block(batch):
    """Rows of the lane-dense (B, Nt*E) output written per grid step."""
    if batch <= 8:
        return batch                        # single block == full array dim (valid)
    cap = 4096                              # (4096, 128) f32 block = 2 MiB / buffer
    half = -(-batch // 2)                   # >= 2 grid steps -> v7x 2-TC sharding
    return min(cap, ((half + 7) // 8) * 8)  # sublane (8) aligned


def tabular_predictor_forward(ctxt, tgt, masks_ctxt, masks_tgt, params, max_len):
    """Pallas forward. ctxt: (B, Nc, E). Returns (B, max_len - Nc, E).

    Mirrors TabularPredictor.forward on the mask_tokens-is-not-None path:
    `tgt` is unused and the masks are only required to be present.
    """
    assert masks_ctxt is not None and masks_tgt is not None, "Masks are required"
    del tgt  # unused: mask_tokens is not None in this module
    B, Nc, E = ctxt.shape
    P = params["w1"].shape[0]
    Nt = max_len - Nc
    assert Nt > 0

    # Batch-invariant target rows + the tiny token-wise MLP, computed ONCE in
    # plain JAX (perf review: the matmuls are (Nt,P)x(P,P) with P=32 — far
    # below MXU granularity — so they must not live in the kernel).
    z = params["mask_tokens"] + params["pos_embed"][Nc:]             # (Nt, P)
    h = jnp.maximum(z @ params["w1"] + params["b1"][0], 0.0)
    h = h @ params["w2"] + params["b2"][0]
    y = h @ params["w_proj"] + params["b_proj"][0]                   # (Nt, E)

    L = Nt * E
    y_flat = y.reshape(1, L)                                         # lane-dense row

    Bt = _pick_batch_block(B)
    grid = (pl.cdiv(B, Bt),)

    out_flat = pl.pallas_call(
        broadcast_store_kernel,
        out_shape=jax.ShapeDtypeStruct((B, L), y_flat.dtype),
        grid_spec=pltpu.PrefetchScalarGridSpec(
            num_scalar_prefetch=0,
            grid=grid,
            in_specs=[pl.BlockSpec((1, L), lambda i: (0, 0))],       # same tiny block every step
            out_specs=pl.BlockSpec((Bt, L), lambda i: (i, 0)),       # lane-dense batch blocks
        ),
        compiler_params=pltpu.CompilerParams(
            dimension_semantics=("parallel",)),
    )(y_flat)

    return out_flat.reshape(B, Nt, E)


def init_params(key, embed_dim, max_len, predictor_embed_dim=32, init_std=0.02):
    P, E = predictor_embed_dim, embed_dim
    ks = jax.random.split(key, 10)
    trunc = lambda k, shape: (
        jax.random.truncated_normal(k, -2.0, 2.0, shape, jnp.float32) * init_std)
    nrm = lambda k, shape: jax.random.normal(k, shape, jnp.float32) * 0.05
    return {
        "w_embed": nrm(ks[0], (E, P)),       # used only by the reference
        "b_embed": nrm(ks[1], (1, P)),       # (dead w.r.t. the returned slice)
        "mask_tokens": trunc(ks[2], (1, P)),
        "pos_embed": trunc(ks[3], (max_len, P)),
        "w1": nrm(ks[4], (P, P)),
        "b1": nrm(ks[5], (1, P)),
        "w2": nrm(ks[6], (P, P)),
        "b2": nrm(ks[7], (1, P)),
        "w_proj": nrm(ks[8], (P, E)),
        "b_proj": nrm(ks[9], (1, E)),
    }


def reference_forward(ctxt, params, max_len):
    """Plain-JAX reference mirroring the PyTorch module (full, incl. ctxt branch)."""
    B, Nc, E = ctxt.shape
    x = ctxt @ params["w_embed"] + params["b_embed"][0]
    x = x + params["pos_embed"][None, :Nc, :]
    pred = params["mask_tokens"][None, :, :] + params["pos_embed"][None, Nc:, :]
    pred = jnp.broadcast_to(pred, (B, max_len - Nc, pred.shape[-1]))
    z = jnp.concatenate([x, pred], axis=1)
    h = jnp.maximum(z @ params["w1"] + params["b1"][0], 0.0)
    h = h @ params["w2"] + params["b2"][0]
    y = h @ params["w_proj"] + params["b_proj"][0]
    return y[:, Nc:, :]


def _run_case(B, embed_dim, max_len, N_ctxt, P, seed):
    key = jax.random.PRNGKey(seed)
    k_params, k_ctxt, k_tgt = jax.random.split(key, 3)
    params = init_params(k_params, embed_dim, max_len, predictor_embed_dim=P)

    ctxt = jax.random.normal(k_ctxt, (B, N_ctxt, embed_dim), jnp.float32)
    # tgt / masks: required by the PyTorch signature; tgt is unused on this
    # path (mask_tokens is not None) and the masks are only assert-checked.
    tgt = jax.random.normal(k_tgt, (B, max_len - N_ctxt, embed_dim), jnp.float32)
    masks_ctxt = jnp.arange(N_ctxt, dtype=jnp.int32)[None, :].repeat(B, axis=0)
    masks_tgt = jnp.arange(N_ctxt, max_len, dtype=jnp.int32)[None, :].repeat(B, axis=0)

    out = tabular_predictor_forward(ctxt, tgt, masks_ctxt, masks_tgt, params, max_len)
    out = jax.block_until_ready(out)

    ref = reference_forward(ctxt, params, max_len)
    assert out.shape == (B, max_len - N_ctxt, embed_dim)
    assert jnp.allclose(out, ref, atol=1e-5, rtol=1e-5)


if __name__ == "__main__":
    # Small shapes consistent with the module's forward (Nt*E = 8*16 = 128).
    _run_case(B=2, embed_dim=16, max_len=16, N_ctxt=8, P=32, seed=0)
    # Non-divisible batch: exercises cdiv grid (2 steps) + masked tail block.
    _run_case(B=20, embed_dim=16, max_len=16, N_ctxt=8, P=32, seed=1)

    print("KERNEL_OK")
</pallas_src>

<mosaic_0001>
module attributes {stable_mosaic.version = 11 : i64} {
  func.func @broadcast_store_kernel(%arg0: i32, %arg1: memref<1x128xf32, #tpu.memory_space<vmem>>, %arg2: memref<2x128xf32, #tpu.memory_space<vmem>>) attributes {dimension_semantics = [#tpu.dimension_semantics<parallel>], iteration_bounds = array<i64: 1>, scalar_prefetch = 0 : i64, scratch_operands = 0 : i64, tpu.core_type = #tpu.core_type<tc>, window_params = [{pipeline_mode = #tpu.pipeline_mode<synchronous>, transform_indices = @transform_0, window_bounds = array<i64: 1, 128>}, {transform_indices = @transform_1, window_bounds = array<i64: 2, 128>}]} {
    %c0 = arith.constant 0 : index
    %c0_0 = arith.constant 0 : index
    %0 = vector.load %arg1[%c0, %c0_0] : memref<1x128xf32, #tpu.memory_space<vmem>>, vector<1x128xf32>
    %1 = vector.shape_cast %0 : vector<1x128xf32> to vector<1x128xf32>
    %2 = vector.broadcast %1 : vector<1x128xf32> to vector<2x128xf32>
    %c0_1 = arith.constant 0 : index
    %c0_2 = arith.constant 0 : index
    %3 = vector.load %arg2[%c0_1, %c0_2] : memref<2x128xf32, #tpu.memory_space<vmem>>, vector<2x128xf32>
    tpu.vector_store %arg2[%c0_1, %c0_2], %2 {strides = array<i32>} : memref<2x128xf32, #tpu.memory_space<vmem>>, vector<2x128xf32>,
    return
  }
  func.func @transform_0(%arg0: i32) -> (i32, i32) {
    %c0_i32 = arith.constant 0 : i32
    %c0_i32_0 = arith.constant 0 : i32
    %c0_i32_1 = arith.constant 0 : i32
    return %c0_i32, %c0_i32_0 : i32, i32
  }
  func.func @transform_1(%arg0: i32) -> (i32, i32) {
    %c0_i32 = arith.constant 0 : i32
    %c0_i32_0 = arith.constant 0 : i32
    return %arg0, %c0_i32 : i32, i32
  }
}

</mosaic_0001>

<bundles_post_ra>
// kernel: tpu_custom_call.1
= control target key start
LH: loop header
LB: loop body
LE: loop exit
PB: predicated region body
PF: predicated region fallthrough
CT: control target
= control target key end

     0   :  { %6 = vsyncpa [#allocation3], 0  ;;  %s118_s0 = inlined_call_operand.hbm [shape: f32[1,128], index: 0, kind: input, shape index: {}]   ;;  %s119_s1 = inlined_call_operand.hbm [shape: f32[2,128], index: 1, kind: output, shape index: {}]  }
   0x1   :  { %7 = vsyncpa [#allocation4], 0  ;;  %s13_s8 = sshll.u32 %s118_s0, 4  ;;  %s100_s9 = smov [#allocation2]   ;;  %s14_s8 = int_to_ptr.hbm [resolvable:$true] %s13_s8 }
   0x2   :  { %s15_s10 = sshll.u32 %s100_s9, 4  ;;  %s16_s10 = int_to_ptr.vmem [resolvable:$true] %s15_s10 }
   0x3   :  { %18 = dma.hbm_to_vmem [thread:$0]  %s14_s8, 16, %s16_s10, [#allocation3]  }
   0x4   :  { %96 = dma.done.wait [#allocation3], 16  }
   0x5   :  { %97 = vsyncadd [#allocation3], 4294967280  ;;  %s101_s11 = smov [#allocation5]   ;;  %s35_s15 = sshll.u32 %s119_s1, 4  ;;  %v47_v0 = vld [vmem:[#allocation2] ss:$0 sm:$0xff]  ;;  %s36_s15 = int_to_ptr.hbm [resolvable:$true] %s35_s15 }
   0x6   :  { %s33_s12 = sshll.u32 %s101_s11, 4  ;;  %27 = vst [vmem:[#allocation5] sm:$0x3] %v47_v0  ;;  %s34_s12 = int_to_ptr.vmem [resolvable:$true] %s33_s12 }
   0x7   :  { %38 = dma.vmem_to_hbm [thread:$0]  %s34_s12, 32, %s36_s15, [#allocation4]  }
   0x8   :  { %98 = dma.done.wait [#allocation4], 32  }
   0x9   :  { %99 = vsyncadd [#allocation4], 4294967264 }
   0xa   :  { %43 = vsyncpa [#allocation3], 1 }
   0xb   :  { %44 = vsyncpa [#allocation4], 1 }

</bundles_post_ra>
